<compile_context>
chip_gen: v5e
topology: v5e:2x2
jax: 0.10.0
libtpu: 0.0.40
codegen_flags: <defaults>
</compile_context>

<pallas_src>
import jax
import jax.numpy as jnp
from jax.experimental import pallas as pl
from jax.experimental.pallas import tpu as pltpu

KH, KW = 2, 2     # nn.Unfold kernel_size
SH, SW = 2, 2     # nn.Unfold stride


def _unfold_kernel(x_ref, o_ref):
    """x_ref: (BN, C, H, W)  ->  o_ref: (BN, C, KH*KW, OH, OW).

    The stride-SH/SW patch gather is expressed as two batched one-hot matmuls
    (select rows, then select columns). This keeps the kernel free of strided
    ref reads, in-kernel concatenates and relayout reshapes; the MXU is
    otherwise idle in this zero-FLOP data-movement op, and the one-hot
    products are numerically exact.
    """
    bn, C, H, W = x_ref.shape
    OH, OW = o_ref.shape[-2], o_ref.shape[-1]
    acc_dt = jnp.float32

    # One-hot selection matrices, built once (hoisted out of all loops).
    h_i = jax.lax.broadcasted_iota(jnp.int32, (C, OH, H), 2)
    oh_i = jax.lax.broadcasted_iota(jnp.int32, (C, OH, H), 1)
    row_sel = [(h_i == oh_i * SH + ki).astype(acc_dt) for ki in range(KH)]   # (C, OH, H)

    w_i = jax.lax.broadcasted_iota(jnp.int32, (C, W, OW), 1)
    ow_i = jax.lax.broadcasted_iota(jnp.int32, (C, W, OW), 2)
    col_sel = [(w_i == ow_i * SW + kj).astype(acc_dt) for kj in range(KW)]   # (C, W, OW)

    x = x_ref[...]                                    # single full tile load
    for b in range(bn):                               # bn is static and small (<= 8)
        xb = x[b].astype(acc_dt)                      # (C, H, W)
        for ki in range(KH):
            # rows[c, oh, w] = x[c, oh*SH + ki, w]
            rows = jnp.einsum("coh,chw->cow", row_sel[ki], xb,
                              preferred_element_type=acc_dt)
            for kj in range(KW):
                # patch[c, oh, ow] = x[c, oh*SH + ki, ow*SW + kj]
                patch = jnp.einsum("cow,cwq->coq", rows, col_sel[kj],
                                   preferred_element_type=acc_dt)
                # Direct store — no concat / flatten inside the kernel.
                o_ref[b, :, ki * KW + kj, :, :] = patch.astype(o_ref.dtype)


def unfold(x):
    """Pallas implementation of nn.Unfold((KH, KW), stride=(SH, SW)) on NCHW x."""
    N, C, H, W = x.shape
    OH = (H - KH) // SH + 1
    OW = (W - KW) // SW + 1

    # Pick the batch block so each grid step moves a meaningful tile while
    # staying well inside scoped VMEM (blocks are double-buffered).
    itemsize = jnp.dtype(x.dtype).itemsize
    per_image_bytes = (C * H * W + C * KH * KW * OH * OW) * itemsize
    target_bytes = 256 * 1024             # amortize ~0.35us per grid step
    vmem_budget = 8 * 1024 * 1024         # in+out per block; x2 when double-buffered
    bn = max(1, min(N, target_bytes // max(per_image_bytes, 1)))
    bn = min(bn, max(1, vmem_budget // max(per_image_bytes, 1)))
    bn = min(bn, 8)                       # bound in-kernel unrolling
    while N % bn:                         # keep the grid exact (no partial blocks)
        bn -= 1

    out5 = pl.pallas_call(
        _unfold_kernel,
        out_shape=jax.ShapeDtypeStruct((N, C, KH * KW, OH, OW), x.dtype),
        grid=(N // bn,),
        in_specs=[pl.BlockSpec((bn, C, H, W), lambda n: (n, 0, 0, 0))],
        out_specs=pl.BlockSpec((bn, C, KH * KW, OH, OW),
                               lambda n: (n, 0, 0, 0, 0)),
        compiler_params=pltpu.CompilerParams(
            dimension_semantics=("parallel",),
            vmem_limit_bytes=32 * 1024 * 1024),
    )(x)

    # Contiguous merges (C, KH*KW) -> C*KH*KW and (OH, OW) -> L are free at the
    # XLA level, so the lane-hostile flatten stays out of the kernel.
    return out5.reshape(N, C * KH * KW, OH * OW)


def unfold_ref(x):
    """Pure-JAX reference matching torch.nn.Unfold((2, 2), stride=2)."""
    N, C, H, W = x.shape
    OH = (H - KH) // SH + 1
    OW = (W - KW) // SW + 1
    cols = []
    for c in range(C):
        for ki in range(KH):
            for kj in range(KW):
                patch = x[:, c,
                          ki:ki + (OH - 1) * SH + 1:SH,
                          kj:kj + (OW - 1) * SW + 1:SW]        # (N, OH, OW)
                cols.append(patch.reshape(N, 1, OH * OW))
    return jnp.concatenate(cols, axis=1)                        # (N, C*KH*KW, L)


if __name__ == "__main__":
    # Check 1: the literal 4x4 example from the PyTorch spec.
    x0 = jnp.arange(1.0, 17.0, dtype=jnp.float32).reshape(1, 1, 4, 4)
    out0 = jax.block_until_ready(unfold(x0))
    expected0 = jnp.array([[[1., 3., 9., 11.],
                            [2., 4., 10., 12.],
                            [5., 7., 13., 15.],
                            [6., 8., 14., 16.]]], dtype=jnp.float32)
    assert out0.shape == (1, 4, 4), out0.shape
    assert jnp.allclose(out0, expected0), out0

    # Check 2: random NCHW batch at the small test shape.
    key = jax.random.PRNGKey(0)
    x = jax.random.normal(key, (2, 4, 16, 16), dtype=jnp.float32)
    out = jax.block_until_ready(unfold(x))
    ref = unfold_ref(x)
    assert out.shape == (2, 4 * KH * KW, (16 // SH) * (16 // SW)), out.shape
    assert out.dtype == x.dtype
    assert jnp.allclose(out, ref), "Pallas unfold does not match reference"

    print("KERNEL_OK")
</pallas_src>

<mosaic_0001>
module attributes {stable_mosaic.version = 11 : i64} {
  func.func @_unfold_kernel(%arg0: i32, %arg1: memref<1x1x4x4xf32, #tpu.memory_space<vmem>>, %arg2: memref<1x1x4x2x2xf32, #tpu.memory_space<vmem>>) attributes {dimension_semantics = [#tpu.dimension_semantics<parallel>], iteration_bounds = array<i64: 1>, scalar_prefetch = 0 : i64, scratch_operands = 0 : i64, tpu.core_type = #tpu.core_type<tc>, window_params = [{transform_indices = @transform_0, window_bounds = array<i64: 1, 1, 4, 4>}, {transform_indices = @transform_1, window_bounds = array<i64: 1, 1, 4, 2, 2>}]} {
    %0 = tpu.iota {dimensions = array<i32: 2>} : vector<1x2x4xi32>
    %1 = tpu.iota {dimensions = array<i32: 1>} : vector<1x2x4xi32>
    %c2_i32 = arith.constant 2 : i32
    %2 = vector.broadcast %c2_i32 : i32 to vector<1x2x4xi32>
    %3 = arith.muli %1, %2 : vector<1x2x4xi32>
    %c0_i32 = arith.constant 0 : i32
    %4 = vector.broadcast %c0_i32 : i32 to vector<1x2x4xi32>
    %5 = arith.addi %3, %4 : vector<1x2x4xi32>
    %6 = arith.cmpi eq, %0, %5 : vector<1x2x4xi32>
    %7 = arith.extui %6 : vector<1x2x4xi1> to vector<1x2x4xi32>
    %8 = arith.sitofp %7 : vector<1x2x4xi32> to vector<1x2x4xf32>
    %c2_i32_0 = arith.constant 2 : i32
    %9 = vector.broadcast %c2_i32_0 : i32 to vector<1x2x4xi32>
    %10 = arith.muli %1, %9 : vector<1x2x4xi32>
    %c1_i32 = arith.constant 1 : i32
    %11 = vector.broadcast %c1_i32 : i32 to vector<1x2x4xi32>
    %12 = arith.addi %10, %11 : vector<1x2x4xi32>
    %13 = arith.cmpi eq, %0, %12 : vector<1x2x4xi32>
    %14 = arith.extui %13 : vector<1x2x4xi1> to vector<1x2x4xi32>
    %15 = arith.sitofp %14 : vector<1x2x4xi32> to vector<1x2x4xf32>
    %16 = tpu.iota {dimensions = array<i32: 1>} : vector<1x4x2xi32>
    %17 = tpu.iota {dimensions = array<i32: 2>} : vector<1x4x2xi32>
    %c2_i32_1 = arith.constant 2 : i32
    %18 = vector.broadcast %c2_i32_1 : i32 to vector<1x4x2xi32>
    %19 = arith.muli %17, %18 : vector<1x4x2xi32>
    %c0_i32_2 = arith.constant 0 : i32
    %20 = vector.broadcast %c0_i32_2 : i32 to vector<1x4x2xi32>
    %21 = arith.addi %19, %20 : vector<1x4x2xi32>
    %22 = arith.cmpi eq, %16, %21 : vector<1x4x2xi32>
    %23 = arith.extui %22 : vector<1x4x2xi1> to vector<1x4x2xi32>
    %24 = arith.sitofp %23 : vector<1x4x2xi32> to vector<1x4x2xf32>
    %c2_i32_3 = arith.constant 2 : i32
    %25 = vector.broadcast %c2_i32_3 : i32 to vector<1x4x2xi32>
    %26 = arith.muli %17, %25 : vector<1x4x2xi32>
    %c1_i32_4 = arith.constant 1 : i32
    %27 = vector.broadcast %c1_i32_4 : i32 to vector<1x4x2xi32>
    %28 = arith.addi %26, %27 : vector<1x4x2xi32>
    %29 = arith.cmpi eq, %16, %28 : vector<1x4x2xi32>
    %30 = arith.extui %29 : vector<1x4x2xi1> to vector<1x4x2xi32>
    %31 = arith.sitofp %30 : vector<1x4x2xi32> to vector<1x4x2xf32>
    %c0 = arith.constant 0 : index
    %c0_5 = arith.constant 0 : index
    %c0_6 = arith.constant 0 : index
    %c0_7 = arith.constant 0 : index
    %32 = vector.load %arg1[%c0, %c0_5, %c0_6, %c0_7] : memref<1x1x4x4xf32, #tpu.memory_space<vmem>>, vector<1x1x4x4xf32>
    %33 = vector.shape_cast %32 : vector<1x1x4x4xf32> to vector<1x4x4xf32>
    "tpu.trace_start"() <{level = 10 : i32, message = "coh,chw->cow"}> : () -> ()
    %cst = arith.constant dense<0.000000e+00> : vector<1x2x4xf32>
    %34 = tpu.matmul %8, %33, %cst {dimension_numbers = #tpu.dot_dimension_numbers<[2], [1], [1], [2], [0, 0, 0, 1, 1, 2], [0], [0]>} : vector<1x2x4xf32>, vector<1x4x4xf32>, vector<1x2x4xf32> -> vector<1x2x4xf32>
    "tpu.trace_stop"() : () -> ()
    "tpu.trace_start"() <{level = 10 : i32, message = "cow,cwq->coq"}> : () -> ()
    %cst_8 = arith.constant dense<0.000000e+00> : vector<1x2x2xf32>
    %35 = tpu.matmul %34, %24, %cst_8 {dimension_numbers = #tpu.dot_dimension_numbers<[2], [1], [1], [2], [0, 0, 0, 1, 1, 2], [0], [0]>} : vector<1x2x4xf32>, vector<1x4x2xf32>, vector<1x2x2xf32> -> vector<1x2x2xf32>
    "tpu.trace_stop"() : () -> ()
    %c0_9 = arith.constant 0 : index
    %c0_10 = arith.constant 0 : index
    %c0_11 = arith.constant 0 : index
    %c0_12 = arith.constant 0 : index
    %c0_13 = arith.constant 0 : index
    %36 = vector.load %arg2[%c0_9, %c0_10, %c0_11, %c0_12, %c0_13] : memref<1x1x4x2x2xf32, #tpu.memory_space<vmem>>, vector<1x1x1x2x2xf32>
    %37 = vector.shape_cast %36 : vector<1x1x1x2x2xf32> to vector<1x2x2xf32>
    %38 = vector.shape_cast %35 : vector<1x2x2xf32> to vector<1x1x1x2x2xf32>
    tpu.vector_store %arg2[%c0_9, %c0_10, %c0_11, %c0_12, %c0_13], %38 {strides = array<i32>} : memref<1x1x4x2x2xf32, #tpu.memory_space<vmem>>, vector<1x1x1x2x2xf32>,
    "tpu.trace_start"() <{level = 10 : i32, message = "cow,cwq->coq"}> : () -> ()
    %cst_14 = arith.constant dense<0.000000e+00> : vector<1x2x2xf32>
    %39 = tpu.matmul %34, %31, %cst_14 {dimension_numbers = #tpu.dot_dimension_numbers<[2], [1], [1], [2], [0, 0, 0, 1, 1, 2], [0], [0]>} : vector<1x2x4xf32>, vector<1x4x2xf32>, vector<1x2x2xf32> -> vector<1x2x2xf32>
    "tpu.trace_stop"() : () -> ()
    %c0_15 = arith.constant 0 : index
    %c0_16 = arith.constant 0 : index
    %c1 = arith.constant 1 : index
    %c0_17 = arith.constant 0 : index
    %c0_18 = arith.constant 0 : index
    %40 = vector.load %arg2[%c0_15, %c0_16, %c1, %c0_17, %c0_18] : memref<1x1x4x2x2xf32, #tpu.memory_space<vmem>>, vector<1x1x1x2x2xf32>
    %41 = vector.shape_cast %40 : vector<1x1x1x2x2xf32> to vector<1x2x2xf32>
    %42 = vector.shape_cast %39 : vector<1x2x2xf32> to vector<1x1x1x2x2xf32>
    tpu.vector_store %arg2[%c0_15, %c0_16, %c1, %c0_17, %c0_18], %42 {strides = array<i32>} : memref<1x1x4x2x2xf32, #tpu.memory_space<vmem>>, vector<1x1x1x2x2xf32>,
    "tpu.trace_start"() <{level = 10 : i32, message = "coh,chw->cow"}> : () -> ()
    %cst_19 = arith.constant dense<0.000000e+00> : vector<1x2x4xf32>
    %43 = tpu.matmul %15, %33, %cst_19 {dimension_numbers = #tpu.dot_dimension_numbers<[2], [1], [1], [2], [0, 0, 0, 1, 1, 2], [0], [0]>} : vector<1x2x4xf32>, vector<1x4x4xf32>, vector<1x2x4xf32> -> vector<1x2x4xf32>
    "tpu.trace_stop"() : () -> ()
    "tpu.trace_start"() <{level = 10 : i32, message = "cow,cwq->coq"}> : () -> ()
    %cst_20 = arith.constant dense<0.000000e+00> : vector<1x2x2xf32>
    %44 = tpu.matmul %43, %24, %cst_20 {dimension_numbers = #tpu.dot_dimension_numbers<[2], [1], [1], [2], [0, 0, 0, 1, 1, 2], [0], [0]>} : vector<1x2x4xf32>, vector<1x4x2xf32>, vector<1x2x2xf32> -> vector<1x2x2xf32>
    "tpu.trace_stop"() : () -> ()
    %c0_21 = arith.constant 0 : index
    %c0_22 = arith.constant 0 : index
    %c2 = arith.constant 2 : index
    %c0_23 = arith.constant 0 : index
    %c0_24 = arith.constant 0 : index
    %45 = vector.load %arg2[%c0_21, %c0_22, %c2, %c0_23, %c0_24] : memref<1x1x4x2x2xf32, #tpu.memory_space<vmem>>, vector<1x1x1x2x2xf32>
    %46 = vector.shape_cast %45 : vector<1x1x1x2x2xf32> to vector<1x2x2xf32>
    %47 = vector.shape_cast %44 : vector<1x2x2xf32> to vector<1x1x1x2x2xf32>
    tpu.vector_store %arg2[%c0_21, %c0_22, %c2, %c0_23, %c0_24], %47 {strides = array<i32>} : memref<1x1x4x2x2xf32, #tpu.memory_space<vmem>>, vector<1x1x1x2x2xf32>,
    "tpu.trace_start"() <{level = 10 : i32, message = "cow,cwq->coq"}> : () -> ()
    %cst_25 = arith.constant dense<0.000000e+00> : vector<1x2x2xf32>
    %48 = tpu.matmul %43, %31, %cst_25 {dimension_numbers = #tpu.dot_dimension_numbers<[2], [1], [1], [2], [0, 0, 0, 1, 1, 2], [0], [0]>} : vector<1x2x4xf32>, vector<1x4x2xf32>, vector<1x2x2xf32> -> vector<1x2x2xf32>
    "tpu.trace_stop"() : () -> ()
    %c0_26 = arith.constant 0 : index
    %c0_27 = arith.constant 0 : index
    %c3 = arith.constant 3 : index
    %c0_28 = arith.constant 0 : index
    %c0_29 = arith.constant 0 : index
    %49 = vector.load %arg2[%c0_26, %c0_27, %c3, %c0_28, %c0_29] : memref<1x1x4x2x2xf32, #tpu.memory_space<vmem>>, vector<1x1x1x2x2xf32>
    %50 = vector.shape_cast %49 : vector<1x1x1x2x2xf32> to vector<1x2x2xf32>
    %51 = vector.shape_cast %48 : vector<1x2x2xf32> to vector<1x1x1x2x2xf32>
    tpu.vector_store %arg2[%c0_26, %c0_27, %c3, %c0_28, %c0_29], %51 {strides = array<i32>} : memref<1x1x4x2x2xf32, #tpu.memory_space<vmem>>, vector<1x1x1x2x2xf32>,
    return
  }
  func.func @transform_0(%arg0: i32) -> (i32, i32, i32, i32) {
    %c0_i32 = arith.constant 0 : i32
    %c0_i32_0 = arith.constant 0 : i32
    %c0_i32_1 = arith.constant 0 : i32
    %c0_i32_2 = arith.constant 0 : i32
    return %arg0, %c0_i32, %c0_i32_0, %c0_i32_1 : i32, i32, i32, i32
  }
  func.func @transform_1(%arg0: i32) -> (i32, i32, i32, i32, i32) {
    %c0_i32 = arith.constant 0 : i32
    %c0_i32_0 = arith.constant 0 : i32
    %c0_i32_1 = arith.constant 0 : i32
    %c0_i32_2 = arith.constant 0 : i32
    %c0_i32_3 = arith.constant 0 : i32
    return %arg0, %c0_i32, %c0_i32_0, %c0_i32_1, %c0_i32_2 : i32, i32, i32, i32, i32
  }
}

</mosaic_0001>

<bundles_post_ra>
// kernel: tpu_custom_call.1
= control target key start
LH: loop header
LB: loop body
LE: loop exit
PB: predicated region body
PF: predicated region fallthrough
CT: control target
= control target key end

     0   :  { %6 = vsyncpa [#allocation3], 0  ;;  %s246_s9 = smov [#allocation2]   ;;  %s285_s0 = inlined_call_operand.hbm [shape: f32[1,1,4,4], index: 0, kind: input, shape index: {}]   ;;  %s286_s1 = inlined_call_operand.vmem [shape: f32[1,1,4,2,2], index: 1, kind: output, shape index: {}]  }
   0x1   :  { %s12_s8 = sshll.u32 %s285_s0, 4  ;;  %s14_s10 = sshll.u32 %s246_s9, 4  ;;  %s13_s8 = int_to_ptr.hbm [resolvable:$true] %s12_s8  ;;  %s15_s10 = int_to_ptr.vmem [resolvable:$true] %s14_s10 }
   0x2   :  { %17 = dma.hbm_to_vmem [thread:$0]  %s13_s8, 64, %s15_s10, [#allocation3]  }
   0x3   :  { %244 = dma.done.wait [#allocation3], 64  }
   0x4   :  { %245 = vsyncadd [#allocation3], 4294967232  ;;  %v22_v0 = vlaneseq  ;;  %vm47_vm0 = vcmask 1043456   ;;  %vm43_vm2 = vcmask 31744   ;;  %v42_v5 = vld [vmem:[#allocation2] sm:$0xf] }
   0x5   :  { %v247_v6 = vmov 0.0   ;;  %203 = vmatpush.msk.msra.mxu0 %vm47_vm0, %v42_v5  ;;  %210 = vmatpush.msk.msra.mxu3 %vm47_vm0, %v42_v5  ;;  %vm97_vm6 = vcmask 9216  }
   0x6   :  { %v23_v1 = vand.u32 127, %v22_v0  ;;  %v25_v2 = vshrl.u32 %v22_v0, 7 }
   0x8   :  { %v26_v3 = vmul.u32 2, %v25_v2  ;;  %v34_v9 = vmul.u32 2, %v23_v1 }
   0xa   :  { %vm27_vm1 = vcmp.eq.s32.totalorder %v23_v1, %v26_v3  ;;  %v30_v4 = vadd.s32 1, %v26_v3  ;;  %v38_v10 = vadd.s32 1, %v34_v9  ;;  %vm35_vm4 = vcmp.eq.s32.totalorder %v25_v2, %v34_v9 }
   0xb   :  { %v199_v7 = vsel %vm27_vm1, 1.0, %v247_v6  ;;  %v201_v11 = vsel %vm35_vm4, 1.0, %v247_v6 }
   0xc   :  { %vm31_vm3 = vcmp.eq.s32.totalorder %v23_v1, %v30_v4  ;;  %204 = vmatmul.msk.f32.vlgmr.msra.gmra.mxu0 %vm43_vm2, %v199_v7  ;;  %vm39_vm5 = vcmp.eq.s32.totalorder %v25_v2, %v38_v10  ;;  %205 = vmatpush.msk.msra.mxu1 %vm47_vm0, %v201_v11 }
   0xd   :  { %v200_v8 = vsel %vm31_vm3, 1.0, %v247_v6  ;;  %v202_v12 = vsel %vm39_vm5, 1.0, %v247_v6  ;;  %212 = vmatpush.msk.msrb.mxu0 %vm47_vm0, %v201_v11 }
   0xe   :  { %211 = vmatmul.msk.f32.vlgmr.msra.gmra.mxu3 %vm43_vm2, %v200_v8  ;;  %207 = vmatpush.msk.msra.mxu2 %vm47_vm0, %v202_v12 }
   0xf   :  { %215 = vmatpush.msk.msrb.mxu1 %vm47_vm0, %v202_v12 }
  0x89   :  { %v68_v13 = vpop.f32.mrf.mxu0 }
  0x8a   :  { %206 = vmatmul.msk.f32.vlgmr.msra.gmra.mxu1 %vm43_vm2, %v68_v13  ;;  %208 = vmatmul.msk.f32.vlgmr.msra.gmra.mxu2 %vm43_vm2, %v68_v13 }
  0x91   :  { %v144_v14 = vpop.f32.mrf.mxu3 }
  0x92   :  { %213 = vmatmul.msk.f32.vlgmr.msrb.gmra.mxu0 %vm43_vm2, %v144_v14  ;;  %216 = vmatmul.msk.f32.vlgmr.msrb.gmra.mxu1 %vm43_vm2, %v144_v14 }
 0x107   :  { %v94_v15 = vpop.f32.mrf.mxu1 }
 0x108   :  { %98 = vst.msk [vmem:[%s286_s1] sm:$0x3] %vm97_vm6, %v94_v15 }
 0x10d   :  { %v119_v16 = vpop.f32.mrf.mxu2 }
 0x10e   :  { %209 = vst.msk [vmem:[%s286_s1 + $0x2] sm:$0x3] %vm97_vm6, %v119_v16 }
 0x10f   :  { %v167_v17 = vpop.f32.mrf.mxu0  ;;  %v189_v18 = vpop.f32.mrf.mxu1 }
 0x110   :  { %214 = vst.msk [vmem:[%s286_s1 + $0x4] sm:$0x3] %vm97_vm6, %v167_v17 }
 0x111   :  { %217 = vst.msk [vmem:[%s286_s1 + $0x6] sm:$0x3] %vm97_vm6, %v189_v18 }
 0x112   :  { %198 = vsyncpa [#allocation3], 1 }

</bundles_post_ra>
